<compile_context>
chip_gen: v7x
topology: tpu7x:2x2x1
jax: 0.10.0
libtpu: 0.0.40
codegen_flags: <defaults>
</compile_context>

<pallas_src>
import functools

import jax
import jax.numpy as jnp
from jax import lax
from jax.experimental import pallas as pl
from jax.experimental.pallas import tpu as pltpu


def rnn_classify_kernel(seq_len, ids_ref, packed_ref, out_ref):
    """Fused embedding+projection gather, RNN recurrence, linear head, sigmoid.

    ids_ref:    (S*B_pad, 1) int32  token ids, time-major (row index = t*B_pad + b)
    packed_ref: (V_pad + D + 8, D)  bf16 packed params:
                  rows [0, V_pad)        : emb_proj = embedding @ W_ih^T + b_rnn
                  rows [V_pad, V_pad+D)  : W_hh^T
                  row  V_pad+D           : classifier weight row
                  row  V_pad+D+1, col 0  : classifier bias
    out_ref:    (B_pad, 1) f32      sigmoid(logits)
    """
    sb = ids_ref.shape[0]
    batch = sb // seq_len
    dim = packed_ref.shape[1]
    vocab_pad = packed_ref.shape[0] - dim - 8

    # --- fused embedding lookup + input projection + bias: one-hot @ emb_proj ---
    ids = ids_ref[...]                                                 # (S*B, 1)
    onehot = (ids == lax.broadcasted_iota(jnp.int32, (sb, vocab_pad), 1)
              ).astype(jnp.bfloat16)                                   # (S*B, V_pad)
    emb_proj = packed_ref[0:vocab_pad, :]                              # (V_pad, D) bf16
    pre_all = jnp.dot(onehot, emb_proj,
                      preferred_element_type=jnp.float32)              # (S*B, D) f32

    # --- serial recurrence, fully unrolled; only h @ W_hh^T on the critical path ---
    w_hh = packed_ref[vocab_pad:vocab_pad + dim, :]                    # (D, D) bf16
    h = jnp.zeros((batch, dim), jnp.float32)                           # h_0 = 0 (PyTorch default)
    for t in range(seq_len):
        pre_t = pre_all[t * batch:(t + 1) * batch, :]                  # 8-aligned static slice
        hb = h.astype(jnp.bfloat16)                                    # single-pass MXU operand
        h = jnp.tanh(pre_t + jnp.dot(hb, w_hh,
                                     preferred_element_type=jnp.float32))

    # --- classifier head: VPU multiply + lane reduce instead of N=1 MXU matmul ---
    head = packed_ref[vocab_pad + dim:vocab_pad + dim + 8, :]          # (8, D) bf16, aligned
    w_cls = head[0:1, :].astype(jnp.float32)                           # (1, D)
    b_cls = head[1:2, 0:1].astype(jnp.float32)                         # (1, 1)
    logits = jnp.sum(h * w_cls, axis=-1, keepdims=True) + b_cls        # (B_pad, 1)
    out_ref[...] = jax.nn.sigmoid(logits)


def pack_params(raw):
    """Fold embedding @ W_ih^T + b into one table (f32), pack all params into a
    single bf16 buffer with 8-row-aligned sections."""
    emb = raw["embedding"]                            # (V, D), row 0 zero (padding_idx=0)
    V, D = emb.shape
    assert D % 8 == 0
    b_rnn = raw["b_ih"] + raw["b_hh"]                                  # (D,)
    emb_proj = emb @ raw["w_ih"].T + b_rnn[None, :]                    # (V, D) f32, exact
    v_pad = ((V + 7) // 8) * 8
    emb_proj_p = jnp.zeros((v_pad, D), jnp.float32).at[:V, :].set(emb_proj)

    head = jnp.zeros((8, D), jnp.float32)
    head = head.at[0, :].set(raw["w_cls"][0])
    head = head.at[1, 0].set(raw["b_cls"][0])

    packed = jnp.concatenate([emb_proj_p, raw["w_hh"].T, head], axis=0)
    return packed.astype(jnp.bfloat16)                # (v_pad + D + 8, D) bf16


@jax.jit
def torch_model_forward(x_ids, packed):
    """Equivalent of TorchModel.forward(x) with y=None -> y_pred of shape (B, 1)."""
    B, S = x_ids.shape
    b_pad = ((B + 7) // 8) * 8                        # sublane-align the batch
    ids = jnp.zeros((b_pad, S), jnp.int32).at[:B, :].set(x_ids.astype(jnp.int32))
    # Time-major flat ids (row = t*b_pad + b): per-step slices inside the kernel
    # are then free 8-aligned vreg selections.  Done under the same jit as the
    # kernel, so there is no standalone transpose dispatch / HBM round trip.
    ids_tm = jnp.transpose(ids).reshape(S * b_pad, 1)

    out_pad = pl.pallas_call(
        functools.partial(rnn_classify_kernel, S),
        out_shape=jax.ShapeDtypeStruct((b_pad, 1), jnp.float32),
        in_specs=[pl.BlockSpec(memory_space=pltpu.MemorySpace.VMEM),
                  pl.BlockSpec(memory_space=pltpu.MemorySpace.VMEM)],
        out_specs=pl.BlockSpec(memory_space=pltpu.MemorySpace.VMEM),
    )(ids_tm, packed)
    return out_pad[:B]


def reference_forward_f32(x_ids, raw):
    """Pure-f32 JAX reference of the original module's forward (semantic check)."""
    emb = jnp.take(raw["embedding"], x_ids, axis=0)                    # (B, S, D)
    B, S, D = emb.shape
    b_rnn = raw["b_ih"] + raw["b_hh"]
    h = jnp.zeros((B, D), jnp.float32)
    for t in range(S):
        h = jnp.tanh(emb[:, t, :] @ raw["w_ih"].T + h @ raw["w_hh"].T + b_rnn)
    logits = h @ raw["w_cls"].T + raw["b_cls"]
    return jax.nn.sigmoid(logits)


def reference_forward_matched(x_ids, packed, seq_len):
    """Reference with the kernel's exact numerics (bf16 weights / bf16 h on the MXU)."""
    D = packed.shape[1]
    v_pad = packed.shape[0] - D - 8
    pf = packed.astype(jnp.float32)
    emb_proj, w_hh = pf[:v_pad], pf[v_pad:v_pad + D]
    w_cls, b_cls = pf[v_pad + D], pf[v_pad + D + 1, 0]
    pre = jnp.take(emb_proj, x_ids, axis=0)                            # (B, S, D)
    B = x_ids.shape[0]
    h = jnp.zeros((B, D), jnp.float32)
    for t in range(seq_len):
        hb = h.astype(jnp.bfloat16).astype(jnp.float32)
        h = jnp.tanh(pre[:, t, :] + hb @ w_hh)
    logits = jnp.sum(h * w_cls[None, :], axis=-1, keepdims=True) + b_cls
    return jax.nn.sigmoid(logits)


def init_params(key, vocab_size, embedding_dim):
    """Deterministic synthetic parameters (shapes/layout match the nn.Module)."""
    k_emb, k_ih, k_hh, k_bih, k_bhh, k_cw, k_cb = jax.random.split(key, 7)
    D = embedding_dim
    bound = 1.0 / jnp.sqrt(jnp.float32(D))

    emb = jax.random.normal(k_emb, (vocab_size, D), jnp.float32)
    emb = emb.at[0].set(0.0)                                           # padding_idx=0

    w_ih = jax.random.uniform(k_ih, (D, D), jnp.float32, -bound, bound)   # (hidden, input)
    w_hh = jax.random.uniform(k_hh, (D, D), jnp.float32, -bound, bound)   # (hidden, hidden)
    b_ih = jax.random.uniform(k_bih, (D,), jnp.float32, -bound, bound)
    b_hh = jax.random.uniform(k_bhh, (D,), jnp.float32, -bound, bound)

    w_cls = jax.random.uniform(k_cw, (1, D), jnp.float32, -bound, bound)  # nn.Linear(D, 1)
    b_cls = jax.random.uniform(k_cb, (1,), jnp.float32, -bound, bound)

    return {"embedding": emb, "w_ih": w_ih, "w_hh": w_hh,
            "b_ih": b_ih, "b_hh": b_hh, "w_cls": w_cls, "b_cls": b_cls}


if __name__ == "__main__":
    vocab_size = 30          # len(vocab)
    embedding_dim = 32
    sentence_len = 8
    batch = 4

    key = jax.random.PRNGKey(0)
    k_params, k_x = jax.random.split(key)

    raw = init_params(k_params, vocab_size, embedding_dim)
    packed = pack_params(raw)
    x_ids = jax.random.randint(k_x, (batch, sentence_len), 0, vocab_size, jnp.int32)

    y_pred = torch_model_forward(x_ids, packed)      # (batch, 1) sigmoid outputs
    jax.block_until_ready(y_pred)

    y_matched = reference_forward_matched(x_ids, packed, sentence_len)
    y_f32 = reference_forward_f32(x_ids, raw)

    assert y_pred.shape == (batch, 1)
    assert bool(jnp.all((y_pred >= 0.0) & (y_pred <= 1.0)))
    # Tight check vs. a reference with identical (bf16-weight) numerics.
    assert bool(jnp.allclose(y_pred, y_matched, atol=2e-3, rtol=2e-3))
    # Loose check vs. the full-f32 original-module semantics.
    assert bool(jnp.allclose(y_pred, y_f32, atol=3e-2, rtol=3e-2))
    print("KERNEL_OK")
</pallas_src>

<mosaic_0001>
module attributes {stable_mosaic.version = 11 : i64} {
  func.func @rnn_classify_kernel(%arg0: memref<64x1xi32, #tpu.memory_space<vmem>>, %arg1: memref<72x32xbf16, #tpu.memory_space<vmem>>, %arg2: memref<8x1xf32, #tpu.memory_space<vmem>>) attributes {dimension_semantics = [], scalar_prefetch = 0 : i64, scratch_operands = 0 : i64, tpu.core_type = #tpu.core_type<tc>} {
    %c0 = arith.constant 0 : index
    %c0_0 = arith.constant 0 : index
    %0 = vector.load %arg0[%c0, %c0_0] : memref<64x1xi32, #tpu.memory_space<vmem>>, vector<64x1xi32>
    %1 = tpu.iota {dimensions = array<i32: 1>} : vector<64x32xi32>
    %2 = vector.broadcast %0 : vector<64x1xi32> to vector<64x32xi32>
    %3 = arith.cmpi eq, %2, %1 : vector<64x32xi32>
    %4 = arith.extui %3 : vector<64x32xi1> to vector<64x32xi32>
    %5 = arith.sitofp %4 : vector<64x32xi32> to vector<64x32xf32>
    %6 = arith.truncf %5 : vector<64x32xf32> to vector<64x32xbf16>
    %c0_1 = arith.constant 0 : index
    %c0_2 = arith.constant 0 : index
    %7 = vector.load %arg1[%c0_1, %c0_2] : memref<72x32xbf16, #tpu.memory_space<vmem>>, vector<32x32xbf16>
    %cst = arith.constant dense<0.000000e+00> : vector<64x32xf32>
    %8 = tpu.matmul %6, %7, %cst {dimension_numbers = #tpu.dot_dimension_numbers<[1], [0], [0], [1], [0, 0, 1, 1], [], []>} : vector<64x32xbf16>, vector<32x32xbf16>, vector<64x32xf32> -> vector<64x32xf32>
    %c32 = arith.constant 32 : index
    %c0_3 = arith.constant 0 : index
    %9 = vector.load %arg1[%c32, %c0_3] : memref<72x32xbf16, #tpu.memory_space<vmem>>, vector<32x32xbf16>
    %cst_4 = arith.constant 0.000000e+00 : f32
    %10 = vector.broadcast %cst_4 : f32 to vector<8x32xf32>
    %11 = vector.extract_strided_slice %8 {offsets = [0, 0], sizes = [8, 32], strides = [1, 1]} : vector<64x32xf32> to vector<8x32xf32>
    %12 = arith.truncf %10 : vector<8x32xf32> to vector<8x32xbf16>
    %cst_5 = arith.constant dense<0.000000e+00> : vector<8x32xf32>
    %13 = tpu.matmul %12, %9, %cst_5 {dimension_numbers = #tpu.dot_dimension_numbers<[1], [0], [0], [1], [0, 0, 1, 1], [], []>} : vector<8x32xbf16>, vector<32x32xbf16>, vector<8x32xf32> -> vector<8x32xf32>
    %14 = arith.addf %11, %13 : vector<8x32xf32>
    %15 = math.tanh %14 : vector<8x32xf32>
    %16 = vector.extract_strided_slice %8 {offsets = [8, 0], sizes = [8, 32], strides = [1, 1]} : vector<64x32xf32> to vector<8x32xf32>
    %17 = arith.truncf %15 : vector<8x32xf32> to vector<8x32xbf16>
    %cst_6 = arith.constant dense<0.000000e+00> : vector<8x32xf32>
    %18 = tpu.matmul %17, %9, %cst_6 {dimension_numbers = #tpu.dot_dimension_numbers<[1], [0], [0], [1], [0, 0, 1, 1], [], []>} : vector<8x32xbf16>, vector<32x32xbf16>, vector<8x32xf32> -> vector<8x32xf32>
    %19 = arith.addf %16, %18 : vector<8x32xf32>
    %20 = math.tanh %19 : vector<8x32xf32>
    %21 = vector.extract_strided_slice %8 {offsets = [16, 0], sizes = [8, 32], strides = [1, 1]} : vector<64x32xf32> to vector<8x32xf32>
    %22 = arith.truncf %20 : vector<8x32xf32> to vector<8x32xbf16>
    %cst_7 = arith.constant dense<0.000000e+00> : vector<8x32xf32>
    %23 = tpu.matmul %22, %9, %cst_7 {dimension_numbers = #tpu.dot_dimension_numbers<[1], [0], [0], [1], [0, 0, 1, 1], [], []>} : vector<8x32xbf16>, vector<32x32xbf16>, vector<8x32xf32> -> vector<8x32xf32>
    %24 = arith.addf %21, %23 : vector<8x32xf32>
    %25 = math.tanh %24 : vector<8x32xf32>
    %26 = vector.extract_strided_slice %8 {offsets = [24, 0], sizes = [8, 32], strides = [1, 1]} : vector<64x32xf32> to vector<8x32xf32>
    %27 = arith.truncf %25 : vector<8x32xf32> to vector<8x32xbf16>
    %cst_8 = arith.constant dense<0.000000e+00> : vector<8x32xf32>
    %28 = tpu.matmul %27, %9, %cst_8 {dimension_numbers = #tpu.dot_dimension_numbers<[1], [0], [0], [1], [0, 0, 1, 1], [], []>} : vector<8x32xbf16>, vector<32x32xbf16>, vector<8x32xf32> -> vector<8x32xf32>
    %29 = arith.addf %26, %28 : vector<8x32xf32>
    %30 = math.tanh %29 : vector<8x32xf32>
    %31 = vector.extract_strided_slice %8 {offsets = [32, 0], sizes = [8, 32], strides = [1, 1]} : vector<64x32xf32> to vector<8x32xf32>
    %32 = arith.truncf %30 : vector<8x32xf32> to vector<8x32xbf16>
    %cst_9 = arith.constant dense<0.000000e+00> : vector<8x32xf32>
    %33 = tpu.matmul %32, %9, %cst_9 {dimension_numbers = #tpu.dot_dimension_numbers<[1], [0], [0], [1], [0, 0, 1, 1], [], []>} : vector<8x32xbf16>, vector<32x32xbf16>, vector<8x32xf32> -> vector<8x32xf32>
    %34 = arith.addf %31, %33 : vector<8x32xf32>
    %35 = math.tanh %34 : vector<8x32xf32>
    %36 = vector.extract_strided_slice %8 {offsets = [40, 0], sizes = [8, 32], strides = [1, 1]} : vector<64x32xf32> to vector<8x32xf32>
    %37 = arith.truncf %35 : vector<8x32xf32> to vector<8x32xbf16>
    %cst_10 = arith.constant dense<0.000000e+00> : vector<8x32xf32>
    %38 = tpu.matmul %37, %9, %cst_10 {dimension_numbers = #tpu.dot_dimension_numbers<[1], [0], [0], [1], [0, 0, 1, 1], [], []>} : vector<8x32xbf16>, vector<32x32xbf16>, vector<8x32xf32> -> vector<8x32xf32>
    %39 = arith.addf %36, %38 : vector<8x32xf32>
    %40 = math.tanh %39 : vector<8x32xf32>
    %41 = vector.extract_strided_slice %8 {offsets = [48, 0], sizes = [8, 32], strides = [1, 1]} : vector<64x32xf32> to vector<8x32xf32>
    %42 = arith.truncf %40 : vector<8x32xf32> to vector<8x32xbf16>
    %cst_11 = arith.constant dense<0.000000e+00> : vector<8x32xf32>
    %43 = tpu.matmul %42, %9, %cst_11 {dimension_numbers = #tpu.dot_dimension_numbers<[1], [0], [0], [1], [0, 0, 1, 1], [], []>} : vector<8x32xbf16>, vector<32x32xbf16>, vector<8x32xf32> -> vector<8x32xf32>
    %44 = arith.addf %41, %43 : vector<8x32xf32>
    %45 = math.tanh %44 : vector<8x32xf32>
    %46 = vector.extract_strided_slice %8 {offsets = [56, 0], sizes = [8, 32], strides = [1, 1]} : vector<64x32xf32> to vector<8x32xf32>
    %47 = arith.truncf %45 : vector<8x32xf32> to vector<8x32xbf16>
    %cst_12 = arith.constant dense<0.000000e+00> : vector<8x32xf32>
    %48 = tpu.matmul %47, %9, %cst_12 {dimension_numbers = #tpu.dot_dimension_numbers<[1], [0], [0], [1], [0, 0, 1, 1], [], []>} : vector<8x32xbf16>, vector<32x32xbf16>, vector<8x32xf32> -> vector<8x32xf32>
    %49 = arith.addf %46, %48 : vector<8x32xf32>
    %50 = math.tanh %49 : vector<8x32xf32>
    %c64 = arith.constant 64 : index
    %c0_13 = arith.constant 0 : index
    %51 = vector.load %arg1[%c64, %c0_13] : memref<72x32xbf16, #tpu.memory_space<vmem>>, vector<8x32xbf16>
    %52 = vector.extract_strided_slice %51 {offsets = [0, 0], sizes = [1, 32], strides = [1, 1]} : vector<8x32xbf16> to vector<1x32xbf16>
    %53 = arith.extf %52 : vector<1x32xbf16> to vector<1x32xf32>
    %54 = vector.extract_strided_slice %51 {offsets = [1, 0], sizes = [1, 1], strides = [1, 1]} : vector<8x32xbf16> to vector<1x1xbf16>
    %55 = arith.extf %54 : vector<1x1xbf16> to vector<1x1xf32>
    %56 = vector.broadcast %53 : vector<1x32xf32> to vector<8x32xf32>
    %57 = arith.mulf %50, %56 : vector<8x32xf32>
    %cst_14 = arith.constant dense<0.000000e+00> : vector<8xf32>
    %58 = vector.multi_reduction <add>, %57, %cst_14 [1] : vector<8x32xf32> to vector<8xf32>
    %59 = vector.shape_cast %58 : vector<8xf32> to vector<8x1xf32>
    %60 = vector.broadcast %55 : vector<1x1xf32> to vector<8x1xf32>
    %61 = arith.addf %59, %60 : vector<8x1xf32>
    %62 = arith.negf %61 : vector<8x1xf32>
    %63 = math.exp %62 : vector<8x1xf32>
    %cst_15 = arith.constant 1.000000e+00 : f32
    %64 = vector.broadcast %cst_15 : f32 to vector<8x1xf32>
    %65 = arith.addf %64, %63 : vector<8x1xf32>
    %66 = arith.divf %64, %65 : vector<8x1xf32>
    %c0_16 = arith.constant 0 : index
    %c0_17 = arith.constant 0 : index
    %67 = vector.load %arg2[%c0_16, %c0_17] : memref<8x1xf32, #tpu.memory_space<vmem>>, vector<8x1xf32>
    tpu.vector_store %arg2[%c0_16, %c0_17], %66 {strides = array<i32>} : memref<8x1xf32, #tpu.memory_space<vmem>>, vector<8x1xf32>,
    return
  }
}

</mosaic_0001>

<bundles_post_ra>
// kernel: torch_model_forward.1
= control target key start
LH: loop header
LB: loop body
LE: loop exit
PB: predicated region body
PF: predicated region fallthrough
CT: control target
= control target key end

     0   :  { %v737_v0 = vmov 0   ;;  %v738_v5 = vmov 0.0   ;;  %vm739_vm0 = vmmov 0   ;;  %v20_v14 = vlaneseq  ;;  %s880_s0 = inlined_call_operand.vmem [shape: s32[64,1], index: 0, kind: input, shape index: {}]   ;;  %s881_s1 = inlined_call_operand.vmem [shape: bf16[72,32], index: 1, kind: input, shape index: {}]   ;;  %s882_s2 = inlined_call_operand.vmem [shape: f32[8,1], index: 2, kind: output, shape index: {}]  }
   0x1   :  { %712 = vset.pattern.permute.xlu1 %v737_v0  ;;  %711 = vset.pattern.permute.xlu0 %v737_v0  ;;  %v14_v1 = vld [vmem:[%s880_s0 + $0x10] sm:$0xff]  ;;  %v12_v2 = vld [vmem:[%s880_s0] sm:$0xff]  ;;  %v15_v3 = vld [vmem:[%s880_s0 + $0x18] sm:$0xff]  ;;  %vm90_vm5 = vcmask 261120   ;;  %vm572_vm10 = vcmask 7168  }
   0x2   :  { %29 = vperm.xlu1 %712, %v14_v1   ;;  %23 = vperm.xlu0 %711, %v12_v2   ;;  %v13_v4 = vld [vmem:[%s880_s0 + $0x8] sm:$0xff]  ;;  %v771_v6 = vld [vmem:[%s881_s1 + $0x10] sm:$0xff]   ;;  %v714_v8 = vld [vmem:[%s881_s1] sm:$0xff]   ;;  %v21_v15 = vand.u32 127, %v20_v14 }
   0x3   :  { %644 = vmatprep.subr.bf16.mxu1 %v738_v5  ;;  %v17_v7 = vld [vmem:[%s880_s0 + $0x28] sm:$0xff]  ;;  %v16_v9 = vld [vmem:[%s880_s0 + $0x20] sm:$0xff]  ;;  %632 = vmatprep.subr.bf16.mxu0 %v714_v8  ;;  %v786_v10 = vld [vmem:[%s881_s1 + $0x18] sm:$0xff]  }
   0x4   :  { %645 = vmatpush3.bf16.msra.mxu1 %v771_v6  ;;  %v716_v11 = vld [vmem:[%s881_s1 + $0x8] sm:$0xff]   ;;  %633 = vmatpush3.bf16.msra.mxu0 %v714_v8  ;;  %v19_v12 = vld [vmem:[%s880_s0 + $0x38] sm:$0xff]  ;;  %v18_v13 = vld [vmem:[%s880_s0 + $0x30] sm:$0xff] }
   0x5   :  { %646 = vmatprep.subr.bf16.mxu1 %v738_v5  ;;  %634 = vmatprep.subr.bf16.mxu0 %v716_v11 }
   0x6   :  { %32 = vperm.xlu1 %712, %v15_v3   ;;  %26 = vperm.xlu0 %711, %v13_v4  }
   0x7   :  { %648 = vmatprep.mubr.msk.bf16.mxu1 %vm739_vm0, %v738_v5 }
   0x8   :  { %647 = vmatpush3.bf16.msra.mxu1 %v786_v10  ;;  %635 = vmatpush3.bf16.msra.mxu0 %v716_v11 }
   0x9   :  { %652 = vmatprep.subr.bf16.mxu1 %v738_v5  ;;  %660 = vmatprep.subr.bf16.mxu0 %v738_v5 }
   0xa   :  { %38 = vperm.xlu1 %712, %v17_v7   ;;  %35 = vperm.xlu0 %711, %v16_v9  }
   0xb   :  { %649 = vmatmul.mubr.bf16.vlgmr.msra.gmra.mrb[0].mxu1 %v737_v0 }
   0xc   :  { %653 = vmatpush3.bf16.msra.mxu1 %v771_v6  ;;  %656 = vmatprep.mubr.msk.bf16.mxu1 %vm739_vm0, %v738_v5 }
   0xd   :  { %654 = vmatprep.subr.bf16.mxu1 %v738_v5 }
   0xe   :  { %44 = vperm.xlu1 %712, %v19_v12   ;;  %41 = vperm.xlu0 %711, %v18_v13  }
  0x10   :  { %655 = vmatpush3.bf16.msra.mxu1 %v786_v10 }
  0x11   :  { %668 = vmatprep.subr.bf16.mxu1 %v738_v5 }
  0x81   :  { %v30_v16 = vpop.permute.xlu1 %29  ;;  %v24_v17 = vpop.permute.xlu0 %23 }
  0x82   :  { %vm48_vm1 = vcmp.eq.s32.totalorder %v30_v16, %v21_v15  ;;  %vm46_vm2 = vcmp.eq.s32.totalorder %v24_v17, %v21_v15 }
  0x83   :  { %v580_v20 = vsel %vm48_vm1, 1.0, %v738_v5  ;;  %v578_v21 = vsel %vm46_vm2, 1.0, %v738_v5 }
  0x85   :  { %v33_v18 = vpop.permute.xlu1 %32  ;;  %v27_v19 = vpop.permute.xlu0 %26 }
  0x86   :  { %vm49_vm3 = vcmp.eq.s32.totalorder %v33_v18, %v21_v15  ;;  %vm47_vm4 = vcmp.eq.s32.totalorder %v27_v19, %v21_v15 }
  0x87   :  { %v581_v22 = vsel %vm49_vm3, 1.0, %v738_v5  ;;  %v579_v23 = vsel %vm47_vm4, 1.0, %v738_v5 }
  0x88   :  { %v71_v24 = vpack.c.bf16 %v581_v22, %v580_v20  ;;  %v70_v25 = vpack.c.bf16 %v579_v23, %v578_v21 }
  0x89   :  { %v39_v26 = vpop.permute.xlu1 %38  ;;  %v36_v27 = vpop.permute.xlu0 %35 }
  0x8a   :  { %vm51_vm6 = vcmp.eq.s32.totalorder %v39_v26, %v21_v15  ;;  %vm50_vm7 = vcmp.eq.s32.totalorder %v36_v27, %v21_v15  ;;  %636 = vmatprep.mubr.msk.bf16.mxu0 %vm90_vm5, %v70_v25 }
  0x8b   :  { %v583_v28 = vsel %vm51_vm6, 1.0, %v738_v5  ;;  %v582_v29 = vsel %vm50_vm7, 1.0, %v738_v5  ;;  %637 = vmatmul.mubr.msk.bf16.vlgmr.msra.gmra.mrb[0].mxu0 %vm90_vm5, %v71_v24 }
  0x8c   :  { %v72_v30 = vpack.c.bf16 %v583_v28, %v582_v29  ;;  %661 = vmatpush3.bf16.msra.mxu0 %v771_v6 }
  0x8d   :  { %v45_v31 = vpop.permute.xlu1 %44  ;;  %v42_v32 = vpop.permute.xlu0 %41  ;;  %662 = vmatprep.subr.bf16.mxu0 %v738_v5 }
  0x8e   :  { %vm53_vm8 = vcmp.eq.s32.totalorder %v45_v31, %v21_v15  ;;  %vm52_vm9 = vcmp.eq.s32.totalorder %v42_v32, %v21_v15  ;;  %640 = vmatprep.mubr.msk.bf16.mxu0 %vm90_vm5, %v72_v30  ;;  %v551_v30 = vld [vmem:[%s881_s1 + $0x20] sm:$0xf]  ;;  %v554_v31 = vshrl.u32 %v20_v14, 7 }
  0x8f   :  { %v585_v33 = vsel %vm53_vm8, 1.0, %v738_v5  ;;  %v584_v34 = vsel %vm52_vm9, 1.0, %v738_v5  ;;  %v552_v32 = vunpack.c.l.bf16 %v551_v30 }
  0x90   :  { %v73_v35 = vpack.c.bf16 %v585_v33, %v584_v34  ;;  %663 = vmatpush3.bf16.msra.mxu0 %v786_v10  ;;  %v563_v33 = vsub.s32 1, %v554_v31 }
  0x91   :  { %676 = vmatprep.subr.bf16.mxu0 %v738_v5 }
  0x92   :  { %v564_v34 = vrot.slane %v552_v32, %v563_v33 }
  0x93   :  { %641 = vmatmul.mubr.msk.bf16.gmra.mrb[4].mxu0 %vm90_vm5, %v73_v35 }
  0x94   :  { %664 = vmatprep.mubr.msk.bf16.mxu0 %vm739_vm0, %v738_v5 }
  0xde   :  { %v221_v36 = vpop.f32.mrb[0].mxu1 }
  0xdf   :  { %v650_v37 = vpop.f32.mrb[1].mxu1 }
  0xe0   :  { %v224_v38 = vpop.f32.mrb[2].mxu1 }
  0xe1   :  { %v651_v39 = vpop.f32.mrb[3].mxu1 }
 0x15e   :  { %v638_v40 = vpop.f32.mrb[0].mxu0 }
 0x15f   :  { %v137_v41 = vpop.f32.mrb[1].mxu0 }
 0x160   :  { %v227_v42 = vadd.f32 %v221_v36, %v137_v41  ;;  %v639_v43 = vpop.f32.mrb[2].mxu0 }
 0x161   :  { %v140_v44 = vpop.f32.mrb[3].mxu0 }
 0x162   :  { %717 = vtanh.f32 %v227_v42 }
 0x166   :  { %v828_v45 = vpop.f32.mrb[4].mxu0 }
 0x167   :  { %v153_v46 = vpop.f32.mrb[5].mxu0 }
 0x168   :  { %v830_v47 = vpop.f32.mrb[6].mxu0 }
 0x169   :  { %v832_v48 = vpop.f32.mrb[7].mxu0 }
 0x16c   :  { %v718_v49 = vpop.eup %717 }
 0x16d   :  { %v229_v50 = vpack.c.bf16 %v718_v49, %v718_v49 }
 0x16f   :  { %657 = vmatmul.mubr.msk.bf16.vlgmr.msra.gmra.mrb[4].mxu1 %vm90_vm5, %v229_v50 }
 0x170   :  { %669 = vmatpush3.bf16.msra.mxu1 %v771_v6  ;;  %672 = vmatprep.mubr.msk.bf16.mxu1 %vm739_vm0, %v738_v5 }
 0x171   :  { %670 = vmatprep.subr.bf16.mxu1 %v738_v5 }
 0x174   :  { %671 = vmatpush3.bf16.msra.mxu1 %v786_v10 }
 0x175   :  { %684 = vmatprep.subr.bf16.mxu1 %v738_v5 }
 0x242   :  { %v267_v51 = vpop.f32.mrb[4].mxu1 }
 0x243   :  { %v273_v52 = vadd.f32 %v267_v51, %v140_v44  ;;  %v658_v53 = vpop.f32.mrb[5].mxu1 }
 0x244   :  { %v270_v54 = vpop.f32.mrb[6].mxu1 }
 0x245   :  { %719 = vtanh.f32 %v273_v52  ;;  %v659_v55 = vpop.f32.mrb[7].mxu1 }
 0x24f   :  { %v720_v56 = vpop.eup %719 }
 0x250   :  { %v275_v57 = vpack.c.bf16 %v720_v56, %v720_v56 }
 0x252   :  { %665 = vmatmul.mubr.msk.bf16.vlgmr.msra.gmra.mrb[8].mxu0 %vm90_vm5, %v275_v57 }
 0x253   :  { %677 = vmatpush3.bf16.msra.mxu0 %v771_v6  ;;  %680 = vmatprep.mubr.msk.bf16.mxu0 %vm739_vm0, %v738_v5 }
 0x254   :  { %678 = vmatprep.subr.bf16.mxu0 %v738_v5 }
 0x257   :  { %679 = vmatpush3.bf16.msra.mxu0 %v786_v10 }
 0x258   :  { %692 = vmatprep.subr.bf16.mxu0 %v738_v5 }
 0x325   :  { %v313_v58 = vpop.f32.mrb[8].mxu0 }
 0x326   :  { %v319_v59 = vadd.f32 %v638_v40, %v313_v58  ;;  %v666_v60 = vpop.f32.mrb[9].mxu0  ;;  %v555_v40 = vsub.s32 0, %v554_v31 }
 0x327   :  { %v316_v61 = vpop.f32.mrb[10].mxu0 }
 0x328   :  { %721 = vtanh.f32 %v319_v59  ;;  %v667_v62 = vpop.f32.mrb[11].mxu0  ;;  %v556_v41 = vrot.slane %v552_v32, %v555_v40 }
 0x332   :  { %v722_v63 = vpop.eup %721 }
 0x333   :  { %v321_v0 = vpack.c.bf16 %v722_v63, %v722_v63 }
 0x335   :  { %673 = vmatmul.mubr.msk.bf16.vlgmr.msra.gmra.mrb[8].mxu1 %vm90_vm5, %v321_v0 }
 0x336   :  { %685 = vmatpush3.bf16.msra.mxu1 %v771_v6  ;;  %688 = vmatprep.mubr.msk.bf16.mxu1 %vm739_vm0, %v738_v5 }
 0x337   :  { %686 = vmatprep.subr.bf16.mxu1 %v738_v5 }
 0x33a   :  { %687 = vmatpush3.bf16.msra.mxu1 %v786_v10 }
 0x33b   :  { %700 = vmatprep.subr.bf16.mxu1 %v738_v5 }
 0x408   :  { %v359_v1 = vpop.f32.mrb[8].mxu1 }
 0x409   :  { %v365_v2 = vadd.f32 %v639_v43, %v359_v1  ;;  %v674_v3 = vpop.f32.mrb[9].mxu1 }
 0x40a   :  { %v362_v4 = vpop.f32.mrb[10].mxu1 }
 0x40b   :  { %723 = vtanh.f32 %v365_v2  ;;  %v675_v7 = vpop.f32.mrb[11].mxu1 }
 0x415   :  { %v724_v8 = vpop.eup %723 }
 0x416   :  { %v367_v9 = vpack.c.bf16 %v724_v8, %v724_v8 }
 0x418   :  { %681 = vmatmul.mubr.msk.bf16.vlgmr.msra.gmra.mrb[12].mxu0 %vm90_vm5, %v367_v9 }
 0x419   :  { %693 = vmatpush3.bf16.msra.mxu0 %v771_v6  ;;  %696 = vmatprep.mubr.msk.bf16.mxu0 %vm739_vm0, %v738_v5 }
 0x41a   :  { %694 = vmatprep.subr.bf16.mxu0 %v738_v5 }
 0x41d   :  { %695 = vmatpush3.bf16.msra.mxu0 %v786_v10 }
 0x4eb   :  { %v405_v11 = vpop.f32.mrb[12].mxu0 }
 0x4ec   :  { %v411_v12 = vadd.f32 %v405_v11, %v153_v46  ;;  %v682_v13 = vpop.f32.mrb[13].mxu0 }
 0x4ed   :  { %v408_v15 = vpop.f32.mrb[14].mxu0 }
 0x4ee   :  { %725 = vtanh.f32 %v411_v12  ;;  %v683_v16 = vpop.f32.mrb[15].mxu0 }
 0x4f8   :  { %v726_v17 = vpop.eup %725 }
 0x4f9   :  { %v413_v18 = vpack.c.bf16 %v726_v17, %v726_v17 }
 0x4fb   :  { %689 = vmatmul.mubr.msk.bf16.vlgmr.msra.gmra.mrb[12].mxu1 %vm90_vm5, %v413_v18 }
 0x4fc   :  { %701 = vmatpush3.bf16.msra.mxu1 %v771_v6  ;;  %704 = vmatprep.mubr.msk.bf16.mxu1 %vm739_vm0, %v738_v5 }
 0x4fd   :  { %702 = vmatprep.subr.bf16.mxu1 %v738_v5 }
 0x500   :  { %703 = vmatpush3.bf16.msra.mxu1 %v786_v10 }
 0x5ce   :  { %v451_v19 = vpop.f32.mrb[12].mxu1 }
 0x5cf   :  { %v457_v20 = vadd.f32 %v451_v19, %v832_v48  ;;  %v690_v21 = vpop.f32.mrb[13].mxu1 }
 0x5d0   :  { %v454_v22 = vpop.f32.mrb[14].mxu1 }
 0x5d1   :  { %727 = vtanh.f32 %v457_v20  ;;  %v691_v23 = vpop.f32.mrb[15].mxu1 }
 0x5db   :  { %v728_v24 = vpop.eup %727 }
 0x5dc   :  { %v459_v25 = vpack.c.bf16 %v728_v24, %v728_v24 }
 0x5de   :  { %697 = vmatmul.mubr.msk.bf16.vlgmr.msra.gmra.mrb[16].mxu0 %vm90_vm5, %v459_v25 }
 0x6b1   :  { %v497_v26 = vpop.f32.mrb[16].mxu0 }
 0x6b2   :  { %v503_v6 = vadd.f32 %v828_v45, %v497_v26  ;;  %v698_v27 = vpop.f32.mrb[17].mxu0 }
 0x6b3   :  { %v500_v28 = vpop.f32.mrb[18].mxu0 }
 0x6b4   :  { %729 = vtanh.f32 %v503_v6  ;;  %v699_v5 = vpop.f32.mrb[19].mxu0 }
 0x6be   :  { %v730_v29 = vpop.eup %729 }
 0x6bf   :  { %v505_v10 = vpack.c.bf16 %v730_v29, %v730_v29 }
 0x6c1   :  { %705 = vmatmul.mubr.msk.bf16.vlgmr.msra.gmra.mrb[16].mxu1 %vm90_vm5, %v505_v10 }
 0x794   :  { %v543_v35 = vpop.f32.mrb[16].mxu1 }
 0x795   :  { %v549_v36 = vadd.f32 %v830_v47, %v543_v35  ;;  %v706_v37 = vpop.f32.mrb[17].mxu1 }
 0x796   :  { %v546_v38 = vpop.f32.mrb[18].mxu1 }
 0x797   :  { %731 = vtanh.f32 %v549_v36  ;;  %v707_v39 = vpop.f32.mrb[19].mxu1 }
 0x7a1   :  { %v732_v42 = vpop.eup %731 }
 0x7a2   :  { %v557_v43 = vmul.f32 %v732_v42, %v556_v41 }
 0x7a4   :  { %v558_v44 = vsel %vm90_vm5, %v557_v43, 0.0 }
 0x7a5   :  { %559 = vadd.xlane.f32.xlu0 %v558_v44 }
 0x832   :  { %v560_v45 = vpop.xlane.xlu0 %559 }
 0x833   :  { %v565_v46 = vadd.f32 %v564_v34, %v560_v45 }
 0x835   :  { %v601_v14 = vmul.f32 -1.442695, %v565_v46 }
 0x837   :  { %733 = vpow2.f32 %v601_v14 }
 0x841   :  { %v734_v48 = vpop.eup %733 }
 0x842   :  { %v569_v49 = vadd.f32 1.0, %v734_v48 }
 0x844   :  { %735 = vrcp.f32 %v569_v49 }
 0x84e   :  { %v736_v47 = vpop.eup %735 }
 0x84f   :  { %573 = vst.msk [vmem:[%s882_s2] sm:$0xff] %vm572_vm10, %v736_v47 }

</bundles_post_ra>
